<compile_context>
chip_gen: v7x
topology: tpu7x:2x2x1
jax: 0.10.0
libtpu: 0.0.40
codegen_flags: <defaults>
</compile_context>

<pallas_src>
import functools

import jax
import jax.numpy as jnp
from jax.experimental import pallas as pl
from jax.experimental.pallas import tpu as pltpu


def _ensemble_kernel(*refs, n_models: int, inv_n: float):
    """refs = (x, W_1..W_n, b_1..b_n, out).

    Sums the per-model weights/biases on the VPU (free at this size), does one
    MXU matmul with f32 accumulation, then bias-add + constant 1/n scale.
    """
    x_ref = refs[0]
    w_refs = refs[1:1 + n_models]
    b_refs = refs[1 + n_models:1 + 2 * n_models]
    o_ref = refs[1 + 2 * n_models]

    w_sum = w_refs[0][...]
    for w_ref in w_refs[1:]:
        w_sum = w_sum + w_ref[...]
    b_sum = b_refs[0][...]
    for b_ref in b_refs[1:]:
        b_sum = b_sum + b_ref[...]

    logits_sum = jnp.dot(x_ref[...], w_sum, preferred_element_type=jnp.float32)
    o_ref[...] = ((logits_sum + b_sum) * inv_n).astype(o_ref.dtype)


def ensemble_forward(x_nchw, w1, w2, w3, b1, b2, b3):
    """x_nchw: [B, C, H, W]; w_i: [D, NUM_CLASSES]; b_i: [NUM_CLASSES].

    w3/b3 may both be None (two-model ensemble, averaged by 2), mirroring the
    PyTorch module's optional model3.
    """
    assert (w3 is None) == (b3 is None), "w3 and b3 must both be given or both be None"

    B = x_nchw.shape[0]
    D, C = w1.shape
    x_flat = x_nchw.reshape(B, D)  # glue: flatten like torch .view(B, -1); free metadata reshape.

    if w3 is not None:
        ws = (w1, w2, w3)
        bs = (b1.reshape(1, C), b2.reshape(1, C), b3.reshape(1, C))
    else:
        ws = (w1, w2)
        bs = (b1.reshape(1, C), b2.reshape(1, C))
    n_models = len(ws)

    kernel = functools.partial(
        _ensemble_kernel, n_models=n_models, inv_n=1.0 / float(n_models)
    )

    # Whole problem is one VMEM-resident block (see budget note above) ->
    # grid-less call; every operand is an untiled VMEM block. Mosaic pads the
    # C=10 lane dimension inside VMEM at zero HBM cost.
    vmem_spec = pl.BlockSpec(memory_space=pltpu.MemorySpace.VMEM)

    # Advisory cost hint so XLA's scheduler knows this custom call is tiny.
    itemsize = 4
    flops = 2 * B * D * C + n_models * D * C          # matmul + in-kernel weight sum
    bytes_accessed = itemsize * (
        x_flat.size + sum(w.size for w in ws) + sum(b.size for b in bs) + B * C
    )

    return pl.pallas_call(
        kernel,
        out_shape=jax.ShapeDtypeStruct((B, C), jnp.float32),
        in_specs=[vmem_spec] * (1 + 2 * n_models),
        out_specs=vmem_spec,
        cost_estimate=pl.CostEstimate(
            flops=flops, transcendentals=0, bytes_accessed=bytes_accessed
        ),
    )(x_flat, *ws, *bs)


if __name__ == "__main__":
    # Small shapes consistent with the module's forward: NCHW image input.
    B, CH, H, W = 2, 4, 16, 16
    D = CH * H * W                 # 1024
    NUM_CLASSES = 10

    key = jax.random.PRNGKey(0)
    kx, k1, k2, k3, kb1, kb2, kb3 = jax.random.split(key, 7)

    x = jax.random.normal(kx, (B, CH, H, W), dtype=jnp.float32)

    # Deterministic synthetic "model" parameters (three linear classifiers).
    scale = 0.02
    w1 = scale * jax.random.normal(k1, (D, NUM_CLASSES), dtype=jnp.float32)
    w2 = scale * jax.random.normal(k2, (D, NUM_CLASSES), dtype=jnp.float32)
    w3 = scale * jax.random.normal(k3, (D, NUM_CLASSES), dtype=jnp.float32)
    b1 = scale * jax.random.normal(kb1, (NUM_CLASSES,), dtype=jnp.float32)
    b2 = scale * jax.random.normal(kb2, (NUM_CLASSES,), dtype=jnp.float32)
    b3 = scale * jax.random.normal(kb3, (NUM_CLASSES,), dtype=jnp.float32)

    out = jax.block_until_ready(ensemble_forward(x, w1, w2, w3, b1, b2, b3))

    # Pure-JAX reference of the ensemble semantics (unfused, per-model order).
    xf = x.reshape(B, D)
    l1 = xf @ w1 + b1
    l2 = xf @ w2 + b2
    l3 = xf @ w3 + b3
    ref = (l1 + l2 + l3) / 3.0

    assert out.shape == (B, NUM_CLASSES)
    assert jnp.allclose(out, ref, atol=1e-4, rtol=1e-4), "mismatch vs 3-model reference"

    # Also exercise the two-model path (model3 is None in the PyTorch module).
    out2 = jax.block_until_ready(ensemble_forward(x, w1, w2, None, b1, b2, None))
    ref2 = (l1 + l2) / 2.0
    assert out2.shape == (B, NUM_CLASSES)
    assert jnp.allclose(out2, ref2, atol=1e-4, rtol=1e-4), "mismatch vs 2-model reference"

    print("KERNEL_OK")
</pallas_src>

<mosaic_0001>
module attributes {stable_mosaic.version = 11 : i64} {
  func.func @_ensemble_kernel(%arg0: memref<2x1024xf32, #tpu.memory_space<vmem>>, %arg1: memref<1024x10xf32, #tpu.memory_space<vmem>>, %arg2: memref<1024x10xf32, #tpu.memory_space<vmem>>, %arg3: memref<1024x10xf32, #tpu.memory_space<vmem>>, %arg4: memref<1x10xf32, #tpu.memory_space<vmem>>, %arg5: memref<1x10xf32, #tpu.memory_space<vmem>>, %arg6: memref<1x10xf32, #tpu.memory_space<vmem>>, %arg7: memref<2x10xf32, #tpu.memory_space<vmem>>) attributes {dimension_semantics = [], scalar_prefetch = 0 : i64, scratch_operands = 0 : i64, tpu.core_type = #tpu.core_type<tc>} {
    %c0 = arith.constant 0 : index
    %c0_0 = arith.constant 0 : index
    %0 = vector.load %arg1[%c0, %c0_0] : memref<1024x10xf32, #tpu.memory_space<vmem>>, vector<1024x10xf32>
    %c0_1 = arith.constant 0 : index
    %c0_2 = arith.constant 0 : index
    %1 = vector.load %arg2[%c0_1, %c0_2] : memref<1024x10xf32, #tpu.memory_space<vmem>>, vector<1024x10xf32>
    %2 = arith.addf %0, %1 : vector<1024x10xf32>
    %c0_3 = arith.constant 0 : index
    %c0_4 = arith.constant 0 : index
    %3 = vector.load %arg3[%c0_3, %c0_4] : memref<1024x10xf32, #tpu.memory_space<vmem>>, vector<1024x10xf32>
    %4 = arith.addf %2, %3 : vector<1024x10xf32>
    %c0_5 = arith.constant 0 : index
    %c0_6 = arith.constant 0 : index
    %5 = vector.load %arg4[%c0_5, %c0_6] : memref<1x10xf32, #tpu.memory_space<vmem>>, vector<1x10xf32>
    %c0_7 = arith.constant 0 : index
    %c0_8 = arith.constant 0 : index
    %6 = vector.load %arg5[%c0_7, %c0_8] : memref<1x10xf32, #tpu.memory_space<vmem>>, vector<1x10xf32>
    %7 = arith.addf %5, %6 : vector<1x10xf32>
    %c0_9 = arith.constant 0 : index
    %c0_10 = arith.constant 0 : index
    %8 = vector.load %arg6[%c0_9, %c0_10] : memref<1x10xf32, #tpu.memory_space<vmem>>, vector<1x10xf32>
    %9 = arith.addf %7, %8 : vector<1x10xf32>
    %c0_11 = arith.constant 0 : index
    %c0_12 = arith.constant 0 : index
    %10 = vector.load %arg0[%c0_11, %c0_12] : memref<2x1024xf32, #tpu.memory_space<vmem>>, vector<2x1024xf32>
    %cst = arith.constant dense<0.000000e+00> : vector<2x10xf32>
    %11 = tpu.matmul %10, %4, %cst {dimension_numbers = #tpu.dot_dimension_numbers<[1], [0], [0], [1], [0, 0, 1, 1], [], []>} : vector<2x1024xf32>, vector<1024x10xf32>, vector<2x10xf32> -> vector<2x10xf32>
    %12 = vector.broadcast %9 : vector<1x10xf32> to vector<2x10xf32>
    %13 = arith.addf %11, %12 : vector<2x10xf32>
    %cst_13 = arith.constant 0.333333343 : f32
    %14 = vector.broadcast %cst_13 : f32 to vector<2x10xf32>
    %15 = arith.mulf %13, %14 : vector<2x10xf32>
    %c0_14 = arith.constant 0 : index
    %c0_15 = arith.constant 0 : index
    %16 = vector.load %arg7[%c0_14, %c0_15] : memref<2x10xf32, #tpu.memory_space<vmem>>, vector<2x10xf32>
    tpu.vector_store %arg7[%c0_14, %c0_15], %15 {strides = array<i32>} : memref<2x10xf32, #tpu.memory_space<vmem>>, vector<2x10xf32>,
    return
  }
}

</mosaic_0001>

<bundles_post_ra>
// kernel: tpu_custom_call.1
= control target key start
LH: loop header
LB: loop body
LE: loop exit
PB: predicated region body
PF: predicated region fallthrough
CT: control target
= control target key end

     0   :  { %s2548_s0 = inlined_call_operand.vmem [shape: f32[2,1024], index: 0, kind: input, shape index: {}]   ;;  %s2549_s1 = inlined_call_operand.vmem [shape: f32[1024,10], index: 1, kind: input, shape index: {}]   ;;  %s2550_s2 = inlined_call_operand.vmem [shape: f32[1024,10], index: 2, kind: input, shape index: {}]   ;;  %s2551_s3 = inlined_call_operand.vmem [shape: f32[1024,10], index: 3, kind: input, shape index: {}]   ;;  %s2552_s4 = inlined_call_operand.vmem [shape: f32[1,10], index: 4, kind: input, shape index: {}]   ;;  %s2553_s5 = inlined_call_operand.vmem [shape: f32[1,10], index: 5, kind: input, shape index: {}]   ;;  %s2554_s6 = inlined_call_operand.vmem [shape: f32[1,10], index: 6, kind: input, shape index: {}]   ;;  %s2555_s7 = inlined_call_operand.hbm [shape: f32[2,10], index: 7, kind: output, shape index: {}]  }
   0x1   :  { %v43_v0 = vld [vmem:[%s2549_s1 + $0x80] sm:$0xff]  ;;  %v44_v1 = vld [vmem:[%s2549_s1 + $0x88] sm:$0xff]  ;;  %v45_v40 = vld [vmem:[%s2549_s1 + $0x90] sm:$0xff] }
   0x2   :  { %v171_v2 = vld [vmem:[%s2550_s2 + $0x80] sm:$0xff]  ;;  %v172_v3 = vld [vmem:[%s2550_s2 + $0x88] sm:$0xff]  ;;  %v46_v41 = vld [vmem:[%s2549_s1 + $0x98] sm:$0xff] }
   0x3   :  { %v299_v4 = vadd.f32 %v171_v2, %v43_v0  ;;  %v427_v5 = vld [vmem:[%s2551_s3 + $0x80] sm:$0xff]  ;;  %v428_v6 = vld [vmem:[%s2551_s3 + $0x88] sm:$0xff]  ;;  %v300_v7 = vadd.f32 %v172_v3, %v44_v1  ;;  %v173_v42 = vld [vmem:[%s2550_s2 + $0x90] sm:$0xff] }
   0x4   :  { %v27_v8 = vld [vmem:[%s2549_s1] sm:$0xff]  ;;  %v28_v9 = vld [vmem:[%s2549_s1 + $0x8] sm:$0xff]  ;;  %v174_v44 = vld [vmem:[%s2550_s2 + $0x98] sm:$0xff]  ;;  %v301_v45 = vadd.f32 %v173_v42, %v45_v40 }
   0x5   :  { %v155_v10 = vld [vmem:[%s2550_s2] sm:$0xff]  ;;  %v555_v11 = vadd.f32 %v427_v5, %v299_v4  ;;  %v156_v12 = vld [vmem:[%s2550_s2 + $0x8] sm:$0xff]  ;;  %v556_v16 = vadd.f32 %v428_v6, %v300_v7  ;;  %v429_v46 = vld [vmem:[%s2551_s3 + $0x90] sm:$0xff]  ;;  %v302_v50 = vadd.f32 %v174_v44, %v46_v41 }
   0x6   :  { %v283_v13 = vadd.f32 %v155_v10, %v27_v8  ;;  %v411_v14 = vld [vmem:[%s2551_s3] sm:$0xff]  ;;  %v412_v15 = vld [vmem:[%s2551_s3 + $0x8] sm:$0xff]  ;;  %v284_v17 = vadd.f32 %v156_v12, %v28_v9  ;;  %v430_v47 = vld [vmem:[%s2551_s3 + $0x98] sm:$0xff]  ;;  %v557_v54 = vadd.f32 %v429_v46, %v301_v45 }
   0x7   :  { %v75_v18 = vld [vmem:[%s2549_s1 + $0x180] sm:$0xff]  ;;  %v76_v19 = vld [vmem:[%s2549_s1 + $0x188] sm:$0xff]  ;;  %v1161_v26 = vpack.c.bf16 %v556_v16, %v555_v11  ;;  %v29_v51 = vld [vmem:[%s2549_s1 + $0x10] sm:$0xff]  ;;  %v558_v60 = vadd.f32 %v430_v47, %v302_v50 }
   0x8   :  { %v203_v20 = vld [vmem:[%s2550_s2 + $0x180] sm:$0xff]  ;;  %v539_v21 = vadd.f32 %v411_v14, %v283_v13  ;;  %v204_v22 = vld [vmem:[%s2550_s2 + $0x188] sm:$0xff]  ;;  %v540_v27 = vadd.f32 %v412_v15, %v284_v17  ;;  %v30_v52 = vld [vmem:[%s2549_s1 + $0x18] sm:$0xff] }
   0x9   :  { %v331_v23 = vadd.f32 %v203_v20, %v75_v18  ;;  %v459_v24 = vld [vmem:[%s2551_s3 + $0x180] sm:$0xff]  ;;  %v460_v25 = vld [vmem:[%s2551_s3 + $0x188] sm:$0xff]  ;;  %v332_v28 = vadd.f32 %v204_v22, %v76_v19  ;;  %1162 = vmatprep.subr.bf16.mxu0 %v1161_v26  ;;  %v157_v53 = vld [vmem:[%s2550_s2 + $0x10] sm:$0xff]  ;;  %v1165_v6 = vpack.c.bf16 %v558_v60, %v557_v54 }
   0xa   :  { %v59_v29 = vld [vmem:[%s2549_s1 + $0x100] sm:$0xff]  ;;  %v60_v30 = vld [vmem:[%s2549_s1 + $0x108] sm:$0xff]  ;;  %v1163_v37 = vpack.c.bf16 %v540_v27, %v539_v21  ;;  %v158_v55 = vld [vmem:[%s2550_s2 + $0x18] sm:$0xff]  ;;  %v285_v56 = vadd.f32 %v157_v53, %v29_v51 }
   0xb   :  { %v187_v31 = vld [vmem:[%s2550_s2 + $0x100] sm:$0xff]  ;;  %v587_v32 = vadd.f32 %v459_v24, %v331_v23  ;;  %v188_v33 = vld [vmem:[%s2550_s2 + $0x108] sm:$0xff]  ;;  %v588_v38 = vadd.f32 %v460_v25, %v332_v28  ;;  %v413_v57 = vld [vmem:[%s2551_s3 + $0x10] sm:$0xff]  ;;  %v286_v61 = vadd.f32 %v158_v55, %v30_v52 }
   0xc   :  { %v315_v34 = vadd.f32 %v187_v31, %v59_v29  ;;  %v443_v35 = vld [vmem:[%s2551_s3 + $0x100] sm:$0xff]  ;;  %v444_v36 = vld [vmem:[%s2551_s3 + $0x108] sm:$0xff]  ;;  %v316_v39 = vadd.f32 %v188_v33, %v60_v30  ;;  %1164 = vmatpush3.bf16.msra.mxu0 %v1163_v37  ;;  %v414_v58 = vld [vmem:[%s2551_s3 + $0x18] sm:$0xff]  ;;  %v541_v1 = vadd.f32 %v413_v57, %v285_v56 }
   0xd   :  { %v1193_v48 = vpack.c.bf16 %v588_v38, %v587_v32  ;;  %v77_v62 = vld [vmem:[%s2549_s1 + $0x190] sm:$0xff]  ;;  %v78_v63 = vld [vmem:[%s2549_s1 + $0x198] sm:$0xff]  ;;  %v542_v7 = vadd.f32 %v414_v58, %v286_v61  ;;  %1166 = vmatprep.subr.bf16.mxu0 %v1165_v6  ;;  %v47_v20 = vld [vmem:[%s2549_s1 + $0xa0] sm:$0xff] }
   0xe   :  { %v571_v43 = vadd.f32 %v443_v35, %v315_v34  ;;  %v572_v49 = vadd.f32 %v444_v36, %v316_v39  ;;  %v205_v0 = vld [vmem:[%s2550_s2 + $0x190] sm:$0xff]  ;;  %v206_v2 = vld [vmem:[%s2550_s2 + $0x198] sm:$0xff]  ;;  %v48_v21 = vld [vmem:[%s2549_s1 + $0xa8] sm:$0xff] }
   0xf   :  { %1194 = vmatprep.subr.bf16.mxu1 %v1193_v48  ;;  %v333_v3 = vadd.f32 %v205_v0, %v77_v62  ;;  %v461_v4 = vld [vmem:[%s2551_s3 + $0x190] sm:$0xff]  ;;  %v462_v5 = vld [vmem:[%s2551_s3 + $0x198] sm:$0xff]  ;;  %v334_v8 = vadd.f32 %v206_v2, %v78_v63  ;;  %v1167_v17 = vpack.c.bf16 %v542_v7, %v541_v1  ;;  %v175_v22 = vld [vmem:[%s2550_s2 + $0xa0] sm:$0xff] }
  0x10   :  { %v1195_v59 = vpack.c.bf16 %v572_v49, %v571_v43  ;;  %v61_v9 = vld [vmem:[%s2549_s1 + $0x110] sm:$0xff]  ;;  %v62_v10 = vld [vmem:[%s2549_s1 + $0x118] sm:$0xff]  ;;  %v176_v24 = vld [vmem:[%s2550_s2 + $0xa8] sm:$0xff]  ;;  %v303_v25 = vadd.f32 %v175_v22, %v47_v20 }
  0x11   :  { %v189_v11 = vld [vmem:[%s2550_s2 + $0x110] sm:$0xff]  ;;  %v589_v12 = vadd.f32 %v461_v4, %v333_v3  ;;  %v190_v13 = vld [vmem:[%s2550_s2 + $0x118] sm:$0xff]  ;;  %v590_v18 = vadd.f32 %v462_v5, %v334_v8  ;;  %v431_v26 = vld [vmem:[%s2551_s3 + $0xa0] sm:$0xff]  ;;  %1168 = vmatpush3.bf16.msra.mxu0 %v1167_v17  ;;  %v304_v30 = vadd.f32 %v176_v24, %v48_v21 }
  0x12   :  { %1196 = vmatpush3.bf16.msra.mxu1 %v1195_v59  ;;  %v317_v14 = vadd.f32 %v189_v11, %v61_v9  ;;  %v445_v15 = vld [vmem:[%s2551_s3 + $0x110] sm:$0xff]  ;;  %v446_v16 = vld [vmem:[%s2551_s3 + $0x118] sm:$0xff]  ;;  %v318_v19 = vadd.f32 %v190_v13, %v62_v10  ;;  %v432_v27 = vld [vmem:[%s2551_s3 + $0xa8] sm:$0xff]  ;;  %v559_v34 = vadd.f32 %v431_v26, %v303_v25 }
  0x13   :  { %v1197_v28 = vpack.c.bf16 %v590_v18, %v589_v12  ;;  %v31_v31 = vld [vmem:[%s2549_s1 + $0x20] sm:$0xff]  ;;  %v32_v32 = vld [vmem:[%s2549_s1 + $0x28] sm:$0xff]  ;;  %v560_v40 = vadd.f32 %v432_v27, %v304_v30  ;;  %v49_v0 = vld [vmem:[%s2549_s1 + $0xb0] sm:$0xff] }
  0x14   :  { %v573_v23 = vadd.f32 %v445_v15, %v317_v14  ;;  %v574_v29 = vadd.f32 %v446_v16, %v318_v19  ;;  %v159_v33 = vld [vmem:[%s2550_s2 + $0x20] sm:$0xff]  ;;  %v160_v35 = vld [vmem:[%s2550_s2 + $0x28] sm:$0xff]  ;;  %v50_v1 = vld [vmem:[%s2549_s1 + $0xb8] sm:$0xff] }
  0x15   :  { %v287_v36 = vadd.f32 %v159_v33, %v31_v31  ;;  %v415_v37 = vld [vmem:[%s2551_s3 + $0x20] sm:$0xff]  ;;  %v416_v38 = vld [vmem:[%s2551_s3 + $0x28] sm:$0xff]  ;;  %1198 = vmatprep.subr.bf16.mxu1 %v1197_v28  ;;  %v288_v41 = vadd.f32 %v160_v35, %v32_v32  ;;  %v1169_v50 = vpack.c.bf16 %v560_v40, %v559_v34  ;;  %v177_v2 = vld [vmem:[%s2550_s2 + $0xb0] sm:$0xff] }
  0x16   :  { %v1199_v39 = vpack.c.bf16 %v574_v29, %v573_v23  ;;  %v79_v42 = vld [vmem:[%s2549_s1 + $0x1a0] sm:$0xff]  ;;  %v80_v43 = vld [vmem:[%s2549_s1 + $0x1a8] sm:$0xff]  ;;  %v178_v4 = vld [vmem:[%s2550_s2 + $0xb8] sm:$0xff]  ;;  %v305_v5 = vadd.f32 %v177_v2, %v49_v0 }
  0x17   :  { %v207_v44 = vld [vmem:[%s2550_s2 + $0x1a0] sm:$0xff]  ;;  %v543_v45 = vadd.f32 %v415_v37, %v287_v36  ;;  %v208_v46 = vld [vmem:[%s2550_s2 + $0x1a8] sm:$0xff]  ;;  %v544_v51 = vadd.f32 %v416_v38, %v288_v41  ;;  %1170 = vmatprep.subr.bf16.mxu0 %v1169_v50  ;;  %v433_v6 = vld [vmem:[%s2551_s3 + $0xb0] sm:$0xff]  ;;  %v306_v10 = vadd.f32 %v178_v4, %v50_v1 }
  0x18   :  { %v335_v47 = vadd.f32 %v207_v44, %v79_v42  ;;  %v463_v48 = vld [vmem:[%s2551_s3 + $0x1a0] sm:$0xff]  ;;  %v464_v49 = vld [vmem:[%s2551_s3 + $0x1a8] sm:$0xff]  ;;  %1200 = vmatpush3.bf16.msra.mxu1 %v1199_v39  ;;  %v336_v52 = vadd.f32 %v208_v46, %v80_v43  ;;  %v434_v7 = vld [vmem:[%s2551_s3 + $0xb8] sm:$0xff]  ;;  %v561_v14 = vadd.f32 %v433_v6, %v305_v5 }
  0x19   :  { %v63_v53 = vld [vmem:[%s2549_s1 + $0x120] sm:$0xff]  ;;  %v64_v54 = vld [vmem:[%s2549_s1 + $0x128] sm:$0xff]  ;;  %v1171_v61 = vpack.c.bf16 %v544_v51, %v543_v45  ;;  %v33_v11 = vld [vmem:[%s2549_s1 + $0x30] sm:$0xff]  ;;  %v562_v20 = vadd.f32 %v434_v7, %v306_v10 }
  0x1a   :  { %v191_v55 = vld [vmem:[%s2550_s2 + $0x120] sm:$0xff]  ;;  %v591_v56 = vadd.f32 %v463_v48, %v335_v47  ;;  %v192_v57 = vld [vmem:[%s2550_s2 + $0x128] sm:$0xff]  ;;  %v592_v62 = vadd.f32 %v464_v49, %v336_v52  ;;  %v34_v12 = vld [vmem:[%s2549_s1 + $0x38] sm:$0xff] }
  0x1b   :  { %v319_v58 = vadd.f32 %v191_v55, %v63_v53  ;;  %v447_v59 = vld [vmem:[%s2551_s3 + $0x120] sm:$0xff]  ;;  %v448_v60 = vld [vmem:[%s2551_s3 + $0x128] sm:$0xff]  ;;  %v320_v63 = vadd.f32 %v192_v57, %v64_v54  ;;  %1172 = vmatpush3.bf16.msra.mxu0 %v1171_v61  ;;  %v161_v13 = vld [vmem:[%s2550_s2 + $0x30] sm:$0xff]  ;;  %v1173_v30 = vpack.c.bf16 %v562_v20, %v561_v14 }
  0x1c   :  { %v1201_v8 = vpack.c.bf16 %v592_v62, %v591_v56  ;;  %v162_v15 = vld [vmem:[%s2550_s2 + $0x38] sm:$0xff]  ;;  %v289_v16 = vadd.f32 %v161_v13, %v33_v11  ;;  %v417_v17 = vld [vmem:[%s2551_s3 + $0x30] sm:$0xff]  ;;  %v51_v44 = vld [vmem:[%s2549_s1 + $0xc0] sm:$0xff] }
  0x1d   :  { %v575_v3 = vadd.f32 %v447_v59, %v319_v58  ;;  %v576_v9 = vadd.f32 %v448_v60, %v320_v63  ;;  %v418_v18 = vld [vmem:[%s2551_s3 + $0x38] sm:$0xff]  ;;  %v290_v21 = vadd.f32 %v162_v15, %v34_v12  ;;  %v81_v22 = vld [vmem:[%s2549_s1 + $0x1b0] sm:$0xff]  ;;  %1174 = vmatprep.subr.bf16.mxu0 %v1173_v30  ;;  %v52_v45 = vld [vmem:[%s2549_s1 + $0xc8] sm:$0xff] }
  0x1e   :  { %1202 = vmatprep.subr.bf16.mxu1 %v1201_v8  ;;  %v82_v23 = vld [vmem:[%s2549_s1 + $0x1b8] sm:$0xff]  ;;  %v209_v24 = vld [vmem:[%s2550_s2 + $0x1b0] sm:$0xff]  ;;  %v545_v25 = vadd.f32 %v417_v17, %v289_v16  ;;  %v179_v46 = vld [vmem:[%s2550_s2 + $0xc0] sm:$0xff] }
  0x1f   :  { %v1203_v19 = vpack.c.bf16 %v576_v9, %v575_v3  ;;  %v210_v26 = vld [vmem:[%s2550_s2 + $0x1b8] sm:$0xff]  ;;  %v337_v27 = vadd.f32 %v209_v24, %v81_v22  ;;  %v465_v28 = vld [vmem:[%s2551_s3 + $0x1b0] sm:$0xff]  ;;  %v546_v31 = vadd.f32 %v418_v18, %v290_v21  ;;  %v180_v48 = vld [vmem:[%s2550_s2 + $0xc8] sm:$0xff]  ;;  %v307_v49 = vadd.f32 %v179_v46, %v51_v44 }
  0x20   :  { %v466_v29 = vld [vmem:[%s2551_s3 + $0x1b8] sm:$0xff]  ;;  %v338_v32 = vadd.f32 %v210_v26, %v82_v23  ;;  %v65_v33 = vld [vmem:[%s2549_s1 + $0x130] sm:$0xff]  ;;  %v435_v50 = vld [vmem:[%s2551_s3 + $0xc0] sm:$0xff]  ;;  %v308_v54 = vadd.f32 %v180_v48, %v52_v45 }
  0x21   :  { %1204 = vmatpush3.bf16.msra.mxu1 %v1203_v19  ;;  %v66_v34 = vld [vmem:[%s2549_s1 + $0x138] sm:$0xff]  ;;  %v193_v35 = vld [vmem:[%s2550_s2 + $0x130] sm:$0xff]  ;;  %v593_v36 = vadd.f32 %v465_v28, %v337_v27  ;;  %v1175_v41 = vpack.c.bf16 %v546_v31, %v545_v25  ;;  %v436_v51 = vld [vmem:[%s2551_s3 + $0xc8] sm:$0xff]  ;;  %v563_v58 = vadd.f32 %v435_v50, %v307_v49 }
  0x22   :  { %v194_v37 = vld [vmem:[%s2550_s2 + $0x138] sm:$0xff]  ;;  %v321_v38 = vadd.f32 %v193_v35, %v65_v33  ;;  %v449_v39 = vld [vmem:[%s2551_s3 + $0x130] sm:$0xff]  ;;  %v594_v42 = vadd.f32 %v466_v29, %v338_v32  ;;  %v35_v55 = vld [vmem:[%s2549_s1 + $0x40] sm:$0xff]  ;;  %v564_v0 = vadd.f32 %v436_v51, %v308_v54 }
  0x23   :  { %v450_v40 = vld [vmem:[%s2551_s3 + $0x138] sm:$0xff]  ;;  %v322_v43 = vadd.f32 %v194_v37, %v66_v34  ;;  %1176 = vmatpush3.bf16.msra.mxu0 %v1175_v41  ;;  %v36_v56 = vld [vmem:[%s2549_s1 + $0x48] sm:$0xff]  ;;  %v163_v57 = vld [vmem:[%s2550_s2 + $0x40] sm:$0xff] }
  0x24   :  { %v577_v47 = vadd.f32 %v449_v39, %v321_v38  ;;  %v1205_v52 = vpack.c.bf16 %v594_v42, %v593_v36  ;;  %v164_v59 = vld [vmem:[%s2550_s2 + $0x48] sm:$0xff]  ;;  %v291_v60 = vadd.f32 %v163_v57, %v35_v55  ;;  %v419_v61 = vld [vmem:[%s2551_s3 + $0x40] sm:$0xff]  ;;  %v1177_v10 = vpack.c.bf16 %v564_v0, %v563_v58  ;;  %v53_v24 = vld [vmem:[%s2549_s1 + $0xd0] sm:$0xff] }
  0x25   :  { %v578_v53 = vadd.f32 %v450_v40, %v322_v43  ;;  %v420_v62 = vld [vmem:[%s2551_s3 + $0x48] sm:$0xff]  ;;  %v292_v1 = vadd.f32 %v164_v59, %v36_v56  ;;  %v83_v2 = vld [vmem:[%s2549_s1 + $0x1c0] sm:$0xff]  ;;  %v54_v25 = vld [vmem:[%s2549_s1 + $0xd8] sm:$0xff] }
  0x26   :  { %1206 = vmatprep.subr.bf16.mxu1 %v1205_v52  ;;  %v84_v3 = vld [vmem:[%s2549_s1 + $0x1c8] sm:$0xff]  ;;  %v211_v4 = vld [vmem:[%s2550_s2 + $0x1c0] sm:$0xff]  ;;  %v547_v5 = vadd.f32 %v419_v61, %v291_v60  ;;  %1178 = vmatprep.subr.bf16.mxu0 %v1177_v10  ;;  %v181_v26 = vld [vmem:[%s2550_s2 + $0xd0] sm:$0xff] }
  0x27   :  { %v1207_v63 = vpack.c.bf16 %v578_v53, %v577_v47  ;;  %v212_v6 = vld [vmem:[%s2550_s2 + $0x1c8] sm:$0xff]  ;;  %v339_v7 = vadd.f32 %v211_v4, %v83_v2  ;;  %v467_v8 = vld [vmem:[%s2551_s3 + $0x1c0] sm:$0xff]  ;;  %v548_v11 = vadd.f32 %v420_v62, %v292_v1  ;;  %v182_v28 = vld [vmem:[%s2550_s2 + $0xd8] sm:$0xff]  ;;  %v309_v29 = vadd.f32 %v181_v26, %v53_v24 }
  0x28   :  { %v468_v9 = vld [vmem:[%s2551_s3 + $0x1c8] sm:$0xff]  ;;  %v340_v12 = vadd.f32 %v212_v6, %v84_v3  ;;  %v67_v13 = vld [vmem:[%s2549_s1 + $0x140] sm:$0xff]  ;;  %v437_v30 = vld [vmem:[%s2551_s3 + $0xd0] sm:$0xff]  ;;  %v310_v34 = vadd.f32 %v182_v28, %v54_v25 }
  0x29   :  { %1208 = vmatpush3.bf16.msra.mxu1 %v1207_v63  ;;  %v68_v14 = vld [vmem:[%s2549_s1 + $0x148] sm:$0xff]  ;;  %v195_v15 = vld [vmem:[%s2550_s2 + $0x140] sm:$0xff]  ;;  %v595_v16 = vadd.f32 %v467_v8, %v339_v7  ;;  %v1179_v21 = vpack.c.bf16 %v548_v11, %v547_v5  ;;  %v438_v31 = vld [vmem:[%s2551_s3 + $0xd8] sm:$0xff]  ;;  %v565_v38 = vadd.f32 %v437_v30, %v309_v29 }
  0x2a   :  { %v196_v17 = vld [vmem:[%s2550_s2 + $0x148] sm:$0xff]  ;;  %v323_v18 = vadd.f32 %v195_v15, %v67_v13  ;;  %v451_v19 = vld [vmem:[%s2551_s3 + $0x140] sm:$0xff]  ;;  %v596_v22 = vadd.f32 %v468_v9, %v340_v12  ;;  %v37_v35 = vld [vmem:[%s2549_s1 + $0x50] sm:$0xff]  ;;  %v566_v44 = vadd.f32 %v438_v31, %v310_v34  ;;  %v675_v34 = vlaneseq }
  0x2b   :  { %v452_v20 = vld [vmem:[%s2551_s3 + $0x148] sm:$0xff]  ;;  %v324_v23 = vadd.f32 %v196_v17, %v68_v14  ;;  %1180 = vmatpush3.bf16.msra.mxu0 %v1179_v21  ;;  %v38_v36 = vld [vmem:[%s2549_s1 + $0x58] sm:$0xff]  ;;  %v165_v37 = vld [vmem:[%s2550_s2 + $0x50] sm:$0xff] }
  0x2c   :  { %v579_v27 = vadd.f32 %v451_v19, %v323_v18  ;;  %v1209_v32 = vpack.c.bf16 %v596_v22, %v595_v16  ;;  %v166_v39 = vld [vmem:[%s2550_s2 + $0x58] sm:$0xff]  ;;  %v293_v40 = vadd.f32 %v165_v37, %v37_v35  ;;  %v421_v41 = vld [vmem:[%s2551_s3 + $0x50] sm:$0xff]  ;;  %v1181_v54 = vpack.c.bf16 %v566_v44, %v565_v38  ;;  %v55_v4 = vld [vmem:[%s2549_s1 + $0xe0] sm:$0xff] }
  0x2d   :  { %v580_v33 = vadd.f32 %v452_v20, %v324_v23  ;;  %v422_v42 = vld [vmem:[%s2551_s3 + $0x58] sm:$0xff]  ;;  %v294_v45 = vadd.f32 %v166_v39, %v38_v36  ;;  %v85_v46 = vld [vmem:[%s2549_s1 + $0x1d0] sm:$0xff]  ;;  %v56_v5 = vld [vmem:[%s2549_s1 + $0xe8] sm:$0xff]  ;;  %v1317_v35 = vmov 1983009808  }
  0x2e   :  { %1210 = vmatprep.subr.bf16.mxu1 %v1209_v32  ;;  %v86_v47 = vld [vmem:[%s2549_s1 + $0x1d8] sm:$0xff]  ;;  %v213_v48 = vld [vmem:[%s2550_s2 + $0x1d0] sm:$0xff]  ;;  %v549_v49 = vadd.f32 %v421_v41, %v293_v40  ;;  %1182 = vmatprep.subr.bf16.mxu0 %v1181_v54  ;;  %v183_v6 = vld [vmem:[%s2550_s2 + $0xe0] sm:$0xff]  ;;  %v684_v36 = vunpack.c.l.s4 %v1317_v35 }
  0x2f   :  { %v1211_v43 = vpack.c.bf16 %v580_v33, %v579_v27  ;;  %v214_v50 = vld [vmem:[%s2550_s2 + $0x1d8] sm:$0xff]  ;;  %v341_v51 = vadd.f32 %v213_v48, %v85_v46  ;;  %v469_v52 = vld [vmem:[%s2551_s3 + $0x1d0] sm:$0xff]  ;;  %v550_v55 = vadd.f32 %v422_v42, %v294_v45  ;;  %v184_v8 = vld [vmem:[%s2550_s2 + $0xe8] sm:$0xff]  ;;  %v311_v9 = vadd.f32 %v183_v6, %v55_v4 }
  0x30   :  { %v470_v53 = vld [vmem:[%s2551_s3 + $0x1d8] sm:$0xff]  ;;  %v342_v56 = vadd.f32 %v214_v50, %v86_v47  ;;  %v69_v57 = vld [vmem:[%s2549_s1 + $0x150] sm:$0xff]  ;;  %v439_v10 = vld [vmem:[%s2551_s3 + $0xe0] sm:$0xff]  ;;  %v312_v14 = vadd.f32 %v184_v8, %v56_v5 }
  0x31   :  { %1212 = vmatpush3.bf16.msra.mxu1 %v1211_v43  ;;  %v70_v58 = vld [vmem:[%s2549_s1 + $0x158] sm:$0xff]  ;;  %v197_v59 = vld [vmem:[%s2550_s2 + $0x150] sm:$0xff]  ;;  %v597_v60 = vadd.f32 %v469_v52, %v341_v51  ;;  %v1183_v1 = vpack.c.bf16 %v550_v55, %v549_v49  ;;  %v440_v11 = vld [vmem:[%s2551_s3 + $0xe8] sm:$0xff]  ;;  %v567_v18 = vadd.f32 %v439_v10, %v311_v9 }
  0x32   :  { %v198_v61 = vld [vmem:[%s2550_s2 + $0x158] sm:$0xff]  ;;  %v325_v62 = vadd.f32 %v197_v59, %v69_v57  ;;  %v453_v63 = vld [vmem:[%s2551_s3 + $0x150] sm:$0xff]  ;;  %v598_v2 = vadd.f32 %v470_v53, %v342_v56  ;;  %v39_v15 = vld [vmem:[%s2549_s1 + $0x60] sm:$0xff]  ;;  %v568_v24 = vadd.f32 %v440_v11, %v312_v14  ;;  %v1881_v59 = vshrl.u32 %v675_v34, 7 }
  0x33   :  { %v454_v0 = vld [vmem:[%s2551_s3 + $0x158] sm:$0xff]  ;;  %v326_v3 = vadd.f32 %v198_v61, %v70_v58  ;;  %1184 = vmatpush3.bf16.msra.mxu0 %v1183_v1  ;;  %v40_v16 = vld [vmem:[%s2549_s1 + $0x68] sm:$0xff]  ;;  %v167_v17 = vld [vmem:[%s2550_s2 + $0x60] sm:$0xff] }
  0x34   :  { %v581_v7 = vadd.f32 %v453_v63, %v325_v62  ;;  %v1213_v12 = vpack.c.bf16 %v598_v2, %v597_v60  ;;  %v168_v19 = vld [vmem:[%s2550_s2 + $0x68] sm:$0xff]  ;;  %v295_v20 = vadd.f32 %v167_v17, %v39_v15  ;;  %v423_v21 = vld [vmem:[%s2551_s3 + $0x60] sm:$0xff]  ;;  %v1185_v37 = vpack.c.bf16 %v568_v24, %v567_v18  ;;  %v57_v51 = vld [vmem:[%s2549_s1 + $0xf0] sm:$0xff] }
  0x35   :  { %v582_v13 = vadd.f32 %v454_v0, %v326_v3  ;;  %v424_v22 = vld [vmem:[%s2551_s3 + $0x68] sm:$0xff]  ;;  %v296_v25 = vadd.f32 %v168_v19, %v40_v16  ;;  %v87_v26 = vld [vmem:[%s2549_s1 + $0x1e0] sm:$0xff]  ;;  %v58_v52 = vld [vmem:[%s2549_s1 + $0xf8] sm:$0xff]  ;;  %v685_v60 = vunpack.c.0.s8 %v684_v36 }
  0x36   :  { %1214 = vmatprep.subr.bf16.mxu1 %v1213_v12  ;;  %v88_v27 = vld [vmem:[%s2549_s1 + $0x1e8] sm:$0xff]  ;;  %v215_v28 = vld [vmem:[%s2550_s2 + $0x1e0] sm:$0xff]  ;;  %v551_v29 = vadd.f32 %v423_v21, %v295_v20  ;;  %1186 = vmatprep.subr.bf16.mxu0 %v1185_v37  ;;  %v185_v53 = vld [vmem:[%s2550_s2 + $0xf0] sm:$0xff] }
  0x37   :  { %v1215_v23 = vpack.c.bf16 %v582_v13, %v581_v7  ;;  %v216_v30 = vld [vmem:[%s2550_s2 + $0x1e8] sm:$0xff]  ;;  %v343_v31 = vadd.f32 %v215_v28, %v87_v26  ;;  %v471_v32 = vld [vmem:[%s2551_s3 + $0x1e0] sm:$0xff]  ;;  %v552_v38 = vadd.f32 %v424_v22, %v296_v25  ;;  %v186_v55 = vld [vmem:[%s2550_s2 + $0xf8] sm:$0xff]  ;;  %v313_v56 = vadd.f32 %v185_v53, %v57_v51 }
  0x38   :  { %v472_v33 = vld [vmem:[%s2551_s3 + $0x1e8] sm:$0xff]  ;;  %v344_v39 = vadd.f32 %v216_v30, %v88_v27  ;;  %v71_v40 = vld [vmem:[%s2549_s1 + $0x160] sm:$0xff]  ;;  %v441_v57 = vld [vmem:[%s2551_s3 + $0xf0] sm:$0xff]  ;;  %v314_v63 = vadd.f32 %v186_v55, %v58_v52  ;;  %v1920_v19 = vsub.s32 %v685_v60, %v1881_v59 }
  0x39   :  { %1216 = vmatpush3.bf16.msra.mxu1 %v1215_v23  ;;  %v72_v41 = vld [vmem:[%s2549_s1 + $0x168] sm:$0xff]  ;;  %v199_v42 = vld [vmem:[%s2550_s2 + $0x160] sm:$0xff]  ;;  %v599_v43 = vadd.f32 %v471_v32, %v343_v31  ;;  %v1187_v48 = vpack.c.bf16 %v552_v38, %v551_v29  ;;  %v442_v58 = vld [vmem:[%s2551_s3 + $0xf8] sm:$0xff]  ;;  %v569_v3 = vadd.f32 %v441_v57, %v313_v56 }
  0x3a   :  { %v200_v44 = vld [vmem:[%s2550_s2 + $0x168] sm:$0xff]  ;;  %v327_v45 = vadd.f32 %v199_v42, %v71_v40  ;;  %v455_v46 = vld [vmem:[%s2551_s3 + $0x160] sm:$0xff]  ;;  %v600_v49 = vadd.f32 %v472_v33, %v344_v39  ;;  %v41_v0 = vld [vmem:[%s2549_s1 + $0x70] sm:$0xff]  ;;  %v570_v9 = vadd.f32 %v442_v58, %v314_v63 }
  0x3b   :  { %v456_v47 = vld [vmem:[%s2551_s3 + $0x168] sm:$0xff]  ;;  %v328_v50 = vadd.f32 %v200_v44, %v72_v41  ;;  %1188 = vmatpush3.bf16.msra.mxu0 %v1187_v48  ;;  %v42_v1 = vld [vmem:[%s2549_s1 + $0x78] sm:$0xff]  ;;  %v169_v2 = vld [vmem:[%s2550_s2 + $0x70] sm:$0xff] }
  0x3c   :  { %v583_v54 = vadd.f32 %v455_v46, %v327_v45  ;;  %v1217_v61 = vpack.c.bf16 %v600_v49, %v599_v43  ;;  %v170_v4 = vld [vmem:[%s2550_s2 + $0x78] sm:$0xff]  ;;  %v297_v5 = vadd.f32 %v169_v2, %v41_v0  ;;  %v425_v6 = vld [vmem:[%s2551_s3 + $0x70] sm:$0xff]  ;;  %v1189_v20 = vpack.c.bf16 %v570_v9, %v569_v3  ;;  %v672_v34 = vld [vmem:[%s2548_s0] sm:$0xff] }
  0x3d   :  { %v584_v62 = vadd.f32 %v456_v47, %v328_v50  ;;  %v426_v7 = vld [vmem:[%s2551_s3 + $0x78] sm:$0xff]  ;;  %v298_v10 = vadd.f32 %v170_v4, %v42_v1  ;;  %v89_v11 = vld [vmem:[%s2549_s1 + $0x1f0] sm:$0xff]  ;;  %v107_v35 = vld [vmem:[%s2549_s1 + $0x280] sm:$0xff]  ;;  %v689_v38 = vrot.slane %v672_v34, %v1920_v19  ;;  %v682_v42 = vcombine.high %v672_v34, %v672_v34 }
  0x3e   :  { %1218 = vmatprep.subr.bf16.mxu1 %v1217_v61  ;;  %v90_v12 = vld [vmem:[%s2549_s1 + $0x1f8] sm:$0xff]  ;;  %v217_v13 = vld [vmem:[%s2550_s2 + $0x1f0] sm:$0xff]  ;;  %v553_v14 = vadd.f32 %v425_v6, %v297_v5  ;;  %1190 = vmatprep.subr.bf16.mxu0 %v1189_v20  ;;  %v108_v36 = vld [vmem:[%s2549_s1 + $0x288] sm:$0xff] }
  0x3f   :  { %v1219_v8 = vpack.c.bf16 %v584_v62, %v583_v54  ;;  %v218_v15 = vld [vmem:[%s2550_s2 + $0x1f8] sm:$0xff]  ;;  %v345_v16 = vadd.f32 %v217_v13, %v89_v11  ;;  %v473_v17 = vld [vmem:[%s2551_s3 + $0x1f0] sm:$0xff]  ;;  %v554_v21 = vadd.f32 %v426_v7, %v298_v10  ;;  %v235_v39 = vld [vmem:[%s2550_s2 + $0x280] sm:$0xff]  ;;  %v697_v50 = vcombine.high %v689_v38, %v689_v38 }
  0x40   :  { %v474_v18 = vld [vmem:[%s2551_s3 + $0x1f8] sm:$0xff]  ;;  %v346_v22 = vadd.f32 %v218_v15, %v90_v12  ;;  %v73_v23 = vld [vmem:[%s2549_s1 + $0x170] sm:$0xff]  ;;  %v236_v40 = vld [vmem:[%s2550_s2 + $0x288] sm:$0xff]  ;;  %v363_v45 = vadd.f32 %v235_v39, %v107_v35  ;;  %v696_v51 = vrot.slane %v682_v42, %v1920_v19 }
  0x41   :  { %1220 = vmatpush3.bf16.msra.mxu1 %v1219_v8  ;;  %v74_v24 = vld [vmem:[%s2549_s1 + $0x178] sm:$0xff]  ;;  %v201_v25 = vld [vmem:[%s2550_s2 + $0x170] sm:$0xff]  ;;  %v601_v26 = vadd.f32 %v473_v17, %v345_v16  ;;  %v1191_v31 = vpack.c.bf16 %v554_v21, %v553_v14  ;;  %v491_v41 = vld [vmem:[%s2551_s3 + $0x280] sm:$0xff]  ;;  %v364_v46 = vadd.f32 %v236_v40, %v108_v36  ;;  %788 = vmatprep.mubr.f32.mxu0 %v697_v50 }
  0x42   :  { %v202_v27 = vld [vmem:[%s2550_s2 + $0x178] sm:$0xff]  ;;  %v329_v28 = vadd.f32 %v201_v25, %v73_v23  ;;  %v457_v29 = vld [vmem:[%s2551_s3 + $0x170] sm:$0xff]  ;;  %v602_v32 = vadd.f32 %v474_v18, %v346_v22  ;;  %v492_v47 = vld [vmem:[%s2551_s3 + $0x288] sm:$0xff]  ;;  %v619_v56 = vadd.f32 %v491_v41, %v363_v45  ;;  %v698_v63 = vcombine.high %v696_v51, %v696_v51 }
  0x43   :  { %v458_v30 = vld [vmem:[%s2551_s3 + $0x178] sm:$0xff]  ;;  %v330_v33 = vadd.f32 %v202_v27, %v74_v24  ;;  %1192 = vmatpush3.bf16.msra.mxu0 %v1191_v31  ;;  %v91_v48 = vld [vmem:[%s2549_s1 + $0x200] sm:$0xff]  ;;  %v92_v49 = vld [vmem:[%s2549_s1 + $0x208] sm:$0xff]  ;;  %v620_v57 = vadd.f32 %v492_v47, %v364_v46 }
  0x44   :  { %v585_v37 = vadd.f32 %v457_v29, %v329_v28  ;;  %v1221_v43 = vpack.c.bf16 %v602_v32, %v601_v26  ;;  %v219_v52 = vld [vmem:[%s2550_s2 + $0x200] sm:$0xff]  ;;  %v220_v53 = vld [vmem:[%s2550_s2 + $0x208] sm:$0xff]  ;;  %858 = vmatprep.mubr.f32.mxu1 %v698_v63  ;;  %v109_v20 = vld [vmem:[%s2549_s1 + $0x290] sm:$0xff] }
  0x45   :  { %v586_v44 = vadd.f32 %v458_v30, %v330_v33  ;;  %v475_v54 = vld [vmem:[%s2551_s3 + $0x200] sm:$0xff]  ;;  %v347_v58 = vadd.f32 %v219_v52, %v91_v48  ;;  %v476_v60 = vld [vmem:[%s2551_s3 + $0x208] sm:$0xff]  ;;  %v348_v0 = vadd.f32 %v220_v53, %v92_v49  ;;  %v1225_v4 = vpack.c.bf16 %v620_v57, %v619_v56  ;;  %v110_v21 = vld [vmem:[%s2549_s1 + $0x298] sm:$0xff] }
  0x46   :  { %1222 = vmatprep.subr.bf16.mxu1 %v1221_v43  ;;  %v139_v61 = vld [vmem:[%s2549_s1 + $0x380] sm:$0xff]  ;;  %v140_v62 = vld [vmem:[%s2549_s1 + $0x388] sm:$0xff]  ;;  %789 = vmatmul.mubr.f32.vlgmr.msra.gmra.mrb[0].mxu0 %v689_v38  ;;  %v237_v24 = vld [vmem:[%s2550_s2 + $0x290] sm:$0xff] }
  0x47   :  { %v1223_v55 = vpack.c.bf16 %v586_v44, %v585_v37  ;;  %v267_v1 = vld [vmem:[%s2550_s2 + $0x380] sm:$0xff]  ;;  %v268_v2 = vld [vmem:[%s2550_s2 + $0x388] sm:$0xff]  ;;  %v603_v5 = vadd.f32 %v475_v54, %v347_v58  ;;  %v604_v10 = vadd.f32 %v476_v60, %v348_v0  ;;  %1226 = vmatprep.subr.bf16.mxu0 %v1225_v4  ;;  %v238_v25 = vld [vmem:[%s2550_s2 + $0x298] sm:$0xff]  ;;  %v365_v29 = vadd.f32 %v237_v24, %v109_v20 }
  0x48   :  { %v523_v3 = vld [vmem:[%s2551_s3 + $0x380] sm:$0xff]  ;;  %v395_v6 = vadd.f32 %v267_v1, %v139_v61  ;;  %v524_v7 = vld [vmem:[%s2551_s3 + $0x388] sm:$0xff]  ;;  %v396_v11 = vadd.f32 %v268_v2, %v140_v62  ;;  %v493_v26 = vld [vmem:[%s2551_s3 + $0x290] sm:$0xff]  ;;  %v366_v30 = vadd.f32 %v238_v25, %v110_v21 }
  0x49   :  { %1224 = vmatpush3.bf16.msra.mxu1 %v1223_v55  ;;  %v123_v8 = vld [vmem:[%s2549_s1 + $0x300] sm:$0xff]  ;;  %v124_v9 = vld [vmem:[%s2549_s1 + $0x308] sm:$0xff]  ;;  %v1227_v22 = vpack.c.bf16 %v604_v10, %v603_v5  ;;  %v494_v31 = vld [vmem:[%s2551_s3 + $0x298] sm:$0xff]  ;;  %v621_v39 = vadd.f32 %v493_v26, %v365_v29 }
  0x4a   :  { %v251_v12 = vld [vmem:[%s2550_s2 + $0x300] sm:$0xff]  ;;  %v252_v13 = vld [vmem:[%s2550_s2 + $0x308] sm:$0xff]  ;;  %v651_v15 = vadd.f32 %v523_v3, %v395_v6  ;;  %v652_v23 = vadd.f32 %v524_v7, %v396_v11  ;;  %v93_v32 = vld [vmem:[%s2549_s1 + $0x210] sm:$0xff]  ;;  %v622_v40 = vadd.f32 %v494_v31, %v366_v30 }
  0x4b   :  { %v507_v14 = vld [vmem:[%s2551_s3 + $0x300] sm:$0xff]  ;;  %v379_v16 = vadd.f32 %v251_v12, %v123_v8  ;;  %v380_v17 = vadd.f32 %v252_v13, %v124_v9  ;;  %v508_v18 = vld [vmem:[%s2551_s3 + $0x308] sm:$0xff]  ;;  %v94_v33 = vld [vmem:[%s2549_s1 + $0x218] sm:$0xff]  ;;  %1228 = vmatpush3.bf16.msra.mxu0 %v1227_v22 }
  0x4c   :  { %859 = vmatmul.mubr.f32.vlgmr.msra.gmra.mrb[0].mxu1 %v696_v51  ;;  %v1257_v34 = vpack.c.bf16 %v652_v23, %v651_v15  ;;  %v221_v35 = vld [vmem:[%s2550_s2 + $0x210] sm:$0xff]  ;;  %v222_v36 = vld [vmem:[%s2550_s2 + $0x218] sm:$0xff]  ;;  %v1229_v49 = vpack.c.bf16 %v622_v40, %v621_v39  ;;  %v111_v2 = vld [vmem:[%s2549_s1 + $0x2a0] sm:$0xff] }
  0x4d   :  { %v635_v27 = vadd.f32 %v507_v14, %v379_v16  ;;  %v636_v28 = vadd.f32 %v508_v18, %v380_v17  ;;  %v477_v37 = vld [vmem:[%s2551_s3 + $0x210] sm:$0xff]  ;;  %v349_v41 = vadd.f32 %v221_v35, %v93_v32  ;;  %v478_v42 = vld [vmem:[%s2551_s3 + $0x218] sm:$0xff]  ;;  %v350_v45 = vadd.f32 %v222_v36, %v94_v33  ;;  %v112_v3 = vld [vmem:[%s2549_s1 + $0x2a8] sm:$0xff] }
  0x4e   :  { %v141_v43 = vld [vmem:[%s2549_s1 + $0x390] sm:$0xff]  ;;  %v142_v44 = vld [vmem:[%s2549_s1 + $0x398] sm:$0xff]  ;;  %1258 = vmatprep.subr.bf16.mxu1 %v1257_v34  ;;  %1230 = vmatprep.subr.bf16.mxu0 %v1229_v49  ;;  %v239_v5 = vld [vmem:[%s2550_s2 + $0x2a0] sm:$0xff] }
  0x4f   :  { %v1259_v38 = vpack.c.bf16 %v636_v28, %v635_v27  ;;  %v269_v46 = vld [vmem:[%s2550_s2 + $0x390] sm:$0xff]  ;;  %v270_v47 = vld [vmem:[%s2550_s2 + $0x398] sm:$0xff]  ;;  %v605_v50 = vadd.f32 %v477_v37, %v349_v41  ;;  %v606_v56 = vadd.f32 %v478_v42, %v350_v45  ;;  %v240_v6 = vld [vmem:[%s2550_s2 + $0x2a8] sm:$0xff]  ;;  %v367_v11 = vadd.f32 %v239_v5, %v111_v2 }
  0x50   :  { %v525_v48 = vld [vmem:[%s2551_s3 + $0x390] sm:$0xff]  ;;  %v397_v51 = vadd.f32 %v269_v46, %v141_v43  ;;  %v398_v52 = vadd.f32 %v270_v47, %v142_v44  ;;  %v526_v53 = vld [vmem:[%s2551_s3 + $0x398] sm:$0xff]  ;;  %v495_v7 = vld [vmem:[%s2551_s3 + $0x2a0] sm:$0xff]  ;;  %v368_v15 = vadd.f32 %v240_v6, %v112_v3 }
  0x51   :  { %1260 = vmatpush3.bf16.msra.mxu1 %v1259_v38  ;;  %v125_v54 = vld [vmem:[%s2549_s1 + $0x310] sm:$0xff]  ;;  %v126_v55 = vld [vmem:[%s2549_s1 + $0x318] sm:$0xff]  ;;  %v1231_v4 = vpack.c.bf16 %v606_v56, %v605_v50  ;;  %v496_v12 = vld [vmem:[%s2551_s3 + $0x2a8] sm:$0xff]  ;;  %v623_v21 = vadd.f32 %v495_v7, %v367_v11 }
  0x52   :  { %v253_v57 = vld [vmem:[%s2550_s2 + $0x310] sm:$0xff]  ;;  %v254_v58 = vld [vmem:[%s2550_s2 + $0x318] sm:$0xff]  ;;  %v653_v61 = vadd.f32 %v525_v48, %v397_v51  ;;  %v654_v62 = vadd.f32 %v526_v53, %v398_v52  ;;  %v95_v13 = vld [vmem:[%s2549_s1 + $0x220] sm:$0xff]  ;;  %v624_v27 = vadd.f32 %v496_v12, %v368_v15 }
  0x53   :  { %v509_v60 = vld [vmem:[%s2551_s3 + $0x310] sm:$0xff]  ;;  %v381_v63 = vadd.f32 %v253_v57, %v125_v54  ;;  %v382_v0 = vadd.f32 %v254_v58, %v126_v55  ;;  %v510_v1 = vld [vmem:[%s2551_s3 + $0x318] sm:$0xff]  ;;  %v96_v14 = vld [vmem:[%s2549_s1 + $0x228] sm:$0xff]  ;;  %1232 = vmatpush3.bf16.msra.mxu0 %v1231_v4 }
  0x54   :  { %v1261_v8 = vpack.c.bf16 %v654_v62, %v653_v61  ;;  %v223_v16 = vld [vmem:[%s2550_s2 + $0x220] sm:$0xff]  ;;  %v224_v17 = vld [vmem:[%s2550_s2 + $0x228] sm:$0xff]  ;;  %v1233_v38 = vpack.c.bf16 %v624_v27, %v623_v21  ;;  %v113_v47 = vld [vmem:[%s2549_s1 + $0x2b0] sm:$0xff] }
  0x55   :  { %v637_v9 = vadd.f32 %v509_v60, %v381_v63  ;;  %v638_v10 = vadd.f32 %v510_v1, %v382_v0  ;;  %v479_v18 = vld [vmem:[%s2551_s3 + $0x220] sm:$0xff]  ;;  %v351_v22 = vadd.f32 %v223_v16, %v95_v13  ;;  %v352_v23 = vadd.f32 %v224_v17, %v96_v14  ;;  %v480_v24 = vld [vmem:[%s2551_s3 + $0x228] sm:$0xff]  ;;  %v114_v48 = vld [vmem:[%s2549_s1 + $0x2b8] sm:$0xff] }
  0x56   :  { %1262 = vmatprep.subr.bf16.mxu1 %v1261_v8  ;;  %v143_v25 = vld [vmem:[%s2549_s1 + $0x3a0] sm:$0xff]  ;;  %v144_v26 = vld [vmem:[%s2549_s1 + $0x3a8] sm:$0xff]  ;;  %1234 = vmatprep.subr.bf16.mxu0 %v1233_v38  ;;  %v241_v50 = vld [vmem:[%s2550_s2 + $0x2b0] sm:$0xff] }
  0x57   :  { %v1263_v20 = vpack.c.bf16 %v638_v10, %v637_v9  ;;  %v271_v28 = vld [vmem:[%s2550_s2 + $0x3a0] sm:$0xff]  ;;  %v272_v29 = vld [vmem:[%s2550_s2 + $0x3a8] sm:$0xff]  ;;  %v607_v31 = vadd.f32 %v479_v18, %v351_v22  ;;  %v608_v32 = vadd.f32 %v480_v24, %v352_v23  ;;  %v242_v51 = vld [vmem:[%s2550_s2 + $0x2b8] sm:$0xff]  ;;  %v369_v55 = vadd.f32 %v241_v50, %v113_v47 }
  0x58   :  { %v527_v30 = vld [vmem:[%s2551_s3 + $0x3a0] sm:$0xff]  ;;  %v399_v33 = vadd.f32 %v271_v28, %v143_v25  ;;  %v400_v34 = vadd.f32 %v272_v29, %v144_v26  ;;  %v528_v35 = vld [vmem:[%s2551_s3 + $0x3a8] sm:$0xff]  ;;  %v497_v52 = vld [vmem:[%s2551_s3 + $0x2b0] sm:$0xff]  ;;  %v370_v56 = vadd.f32 %v242_v51, %v114_v48 }
  0x59   :  { %1264 = vmatpush3.bf16.msra.mxu1 %v1263_v20  ;;  %v127_v36 = vld [vmem:[%s2549_s1 + $0x320] sm:$0xff]  ;;  %v128_v37 = vld [vmem:[%s2549_s1 + $0x328] sm:$0xff]  ;;  %v1235_v42 = vpack.c.bf16 %v608_v32, %v607_v31  ;;  %v498_v57 = vld [vmem:[%s2551_s3 + $0x2b8] sm:$0xff]  ;;  %v625_v1 = vadd.f32 %v497_v52, %v369_v55 }
  0x5a   :  { %v255_v39 = vld [vmem:[%s2550_s2 + $0x320] sm:$0xff]  ;;  %v256_v40 = vld [vmem:[%s2550_s2 + $0x328] sm:$0xff]  ;;  %v655_v43 = vadd.f32 %v527_v30, %v399_v33  ;;  %v656_v44 = vadd.f32 %v528_v35, %v400_v34  ;;  %v97_v58 = vld [vmem:[%s2549_s1 + $0x230] sm:$0xff]  ;;  %v626_v2 = vadd.f32 %v498_v57, %v370_v56 }
  0x5b   :  { %v511_v41 = vld [vmem:[%s2551_s3 + $0x320] sm:$0xff]  ;;  %v383_v45 = vadd.f32 %v255_v39, %v127_v36  ;;  %v512_v46 = vld [vmem:[%s2551_s3 + $0x328] sm:$0xff]  ;;  %v384_v49 = vadd.f32 %v256_v40, %v128_v37  ;;  %1236 = vmatpush3.bf16.msra.mxu0 %v1235_v42  ;;  %v98_v60 = vld [vmem:[%s2549_s1 + $0x238] sm:$0xff] }
  0x5c   :  { %v1265_v53 = vpack.c.bf16 %v656_v44, %v655_v43  ;;  %v225_v62 = vld [vmem:[%s2550_s2 + $0x230] sm:$0xff]  ;;  %v226_v63 = vld [vmem:[%s2550_s2 + $0x238] sm:$0xff]  ;;  %v1237_v12 = vpack.c.bf16 %v626_v2, %v625_v1  ;;  %v115_v29 = vld [vmem:[%s2549_s1 + $0x2c0] sm:$0xff] }
  0x5d   :  { %v639_v54 = vadd.f32 %v511_v41, %v383_v45  ;;  %v640_v61 = vadd.f32 %v512_v46, %v384_v49  ;;  %v481_v0 = vld [vmem:[%s2551_s3 + $0x230] sm:$0xff]  ;;  %v353_v3 = vadd.f32 %v225_v62, %v97_v58  ;;  %v354_v4 = vadd.f32 %v226_v63, %v98_v60  ;;  %v482_v5 = vld [vmem:[%s2551_s3 + $0x238] sm:$0xff]  ;;  %v116_v30 = vld [vmem:[%s2549_s1 + $0x2c8] sm:$0xff] }
  0x5e   :  { %1266 = vmatprep.subr.bf16.mxu1 %v1265_v53  ;;  %v145_v6 = vld [vmem:[%s2549_s1 + $0x3b0] sm:$0xff]  ;;  %v146_v7 = vld [vmem:[%s2549_s1 + $0x3b8] sm:$0xff]  ;;  %1238 = vmatprep.subr.bf16.mxu0 %v1237_v12  ;;  %v243_v32 = vld [vmem:[%s2550_s2 + $0x2c0] sm:$0xff] }
  0x5f   :  { %v1267_v8 = vpack.c.bf16 %v640_v61, %v639_v54  ;;  %v273_v9 = vld [vmem:[%s2550_s2 + $0x3b0] sm:$0xff]  ;;  %v274_v10 = vld [vmem:[%s2550_s2 + $0x3b8] sm:$0xff]  ;;  %v609_v13 = vadd.f32 %v481_v0, %v353_v3  ;;  %v610_v14 = vadd.f32 %v482_v5, %v354_v4  ;;  %v244_v33 = vld [vmem:[%s2550_s2 + $0x2c8] sm:$0xff]  ;;  %v371_v37 = vadd.f32 %v243_v32, %v115_v29 }
  0x60   :  { %v529_v11 = vld [vmem:[%s2551_s3 + $0x3b0] sm:$0xff]  ;;  %v401_v15 = vadd.f32 %v273_v9, %v145_v6  ;;  %v530_v16 = vld [vmem:[%s2551_s3 + $0x3b8] sm:$0xff]  ;;  %v402_v20 = vadd.f32 %v274_v10, %v146_v7  ;;  %v499_v34 = vld [vmem:[%s2551_s3 + $0x2c0] sm:$0xff]  ;;  %v372_v38 = vadd.f32 %v244_v33, %v116_v30 }
  0x61   :  { %v129_v17 = vld [vmem:[%s2549_s1 + $0x330] sm:$0xff]  ;;  %v130_v18 = vld [vmem:[%s2549_s1 + $0x338] sm:$0xff]  ;;  %1268 = vmatpush3.bf16.msra.mxu1 %v1267_v8  ;;  %v1239_v24 = vpack.c.bf16 %v610_v14, %v609_v13  ;;  %v500_v39 = vld [vmem:[%s2551_s3 + $0x2c8] sm:$0xff]  ;;  %v627_v47 = vadd.f32 %v499_v34, %v371_v37 }
  0x62   :  { %v257_v21 = vld [vmem:[%s2550_s2 + $0x330] sm:$0xff]  ;;  %v258_v22 = vld [vmem:[%s2550_s2 + $0x338] sm:$0xff]  ;;  %v657_v25 = vadd.f32 %v529_v11, %v401_v15  ;;  %v658_v31 = vadd.f32 %v530_v16, %v402_v20  ;;  %v99_v40 = vld [vmem:[%s2549_s1 + $0x240] sm:$0xff]  ;;  %v628_v48 = vadd.f32 %v500_v39, %v372_v38 }
  0x63   :  { %v513_v23 = vld [vmem:[%s2551_s3 + $0x330] sm:$0xff]  ;;  %v385_v26 = vadd.f32 %v257_v21, %v129_v17  ;;  %v386_v27 = vadd.f32 %v258_v22, %v130_v18  ;;  %v514_v28 = vld [vmem:[%s2551_s3 + $0x338] sm:$0xff]  ;;  %1240 = vmatpush3.bf16.msra.mxu0 %v1239_v24  ;;  %v100_v41 = vld [vmem:[%s2549_s1 + $0x248] sm:$0xff] }
  0x64   :  { %v1269_v42 = vpack.c.bf16 %v658_v31, %v657_v25  ;;  %v227_v43 = vld [vmem:[%s2550_s2 + $0x240] sm:$0xff]  ;;  %v228_v44 = vld [vmem:[%s2550_s2 + $0x248] sm:$0xff]  ;;  %v1241_v57 = vpack.c.bf16 %v628_v48, %v627_v47  ;;  %v117_v10 = vld [vmem:[%s2549_s1 + $0x2d0] sm:$0xff] }
  0x65   :  { %v641_v35 = vadd.f32 %v513_v23, %v385_v26  ;;  %v642_v36 = vadd.f32 %v514_v28, %v386_v27  ;;  %v483_v45 = vld [vmem:[%s2551_s3 + $0x240] sm:$0xff]  ;;  %v355_v49 = vadd.f32 %v227_v43, %v99_v40  ;;  %v484_v50 = vld [vmem:[%s2551_s3 + $0x248] sm:$0xff]  ;;  %v356_v53 = vadd.f32 %v228_v44, %v100_v41  ;;  %v118_v11 = vld [vmem:[%s2549_s1 + $0x2d8] sm:$0xff] }
  0x66   :  { %v147_v51 = vld [vmem:[%s2549_s1 + $0x3c0] sm:$0xff]  ;;  %v148_v52 = vld [vmem:[%s2549_s1 + $0x3c8] sm:$0xff]  ;;  %1270 = vmatprep.subr.bf16.mxu1 %v1269_v42  ;;  %1242 = vmatprep.subr.bf16.mxu0 %v1241_v57  ;;  %v245_v13 = vld [vmem:[%s2550_s2 + $0x2d0] sm:$0xff] }
  0x67   :  { %v1271_v46 = vpack.c.bf16 %v642_v36, %v641_v35  ;;  %v275_v54 = vld [vmem:[%s2550_s2 + $0x3c0] sm:$0xff]  ;;  %v276_v55 = vld [vmem:[%s2550_s2 + $0x3c8] sm:$0xff]  ;;  %v611_v58 = vadd.f32 %v483_v45, %v355_v49  ;;  %v612_v1 = vadd.f32 %v484_v50, %v356_v53  ;;  %v246_v14 = vld [vmem:[%s2550_s2 + $0x2d8] sm:$0xff]  ;;  %v373_v20 = vadd.f32 %v245_v13, %v117_v10 }
  0x68   :  { %v531_v56 = vld [vmem:[%s2551_s3 + $0x3c0] sm:$0xff]  ;;  %v403_v60 = vadd.f32 %v275_v54, %v147_v51  ;;  %v404_v61 = vadd.f32 %v276_v55, %v148_v52  ;;  %v532_v62 = vld [vmem:[%s2551_s3 + $0x3c8] sm:$0xff]  ;;  %v501_v15 = vld [vmem:[%s2551_s3 + $0x2d0] sm:$0xff]  ;;  %v374_v24 = vadd.f32 %v246_v14, %v118_v11 }
  0x69   :  { %1272 = vmatpush3.bf16.msra.mxu1 %v1271_v46  ;;  %v131_v63 = vld [vmem:[%s2549_s1 + $0x340] sm:$0xff]  ;;  %v132_v0 = vld [vmem:[%s2549_s1 + $0x348] sm:$0xff]  ;;  %v1243_v12 = vpack.c.bf16 %v612_v1, %v611_v58  ;;  %v502_v21 = vld [vmem:[%s2551_s3 + $0x2d8] sm:$0xff]  ;;  %v629_v29 = vadd.f32 %v501_v15, %v373_v20 }
  0x6a   :  { %v259_v2 = vld [vmem:[%s2550_s2 + $0x340] sm:$0xff]  ;;  %v260_v3 = vld [vmem:[%s2550_s2 + $0x348] sm:$0xff]  ;;  %v659_v5 = vadd.f32 %v531_v56, %v403_v60  ;;  %v660_v6 = vadd.f32 %v532_v62, %v404_v61  ;;  %v101_v22 = vld [vmem:[%s2549_s1 + $0x250] sm:$0xff]  ;;  %v630_v35 = vadd.f32 %v502_v21, %v374_v24 }
  0x6b   :  { %v515_v4 = vld [vmem:[%s2551_s3 + $0x340] sm:$0xff]  ;;  %v387_v7 = vadd.f32 %v259_v2, %v131_v63  ;;  %v388_v8 = vadd.f32 %v260_v3, %v132_v0  ;;  %v516_v9 = vld [vmem:[%s2551_s3 + $0x348] sm:$0xff]  ;;  %v102_v23 = vld [vmem:[%s2549_s1 + $0x258] sm:$0xff]  ;;  %1244 = vmatpush3.bf16.msra.mxu0 %v1243_v12 }
  0x6c   :  { %v1273_v16 = vpack.c.bf16 %v660_v6, %v659_v5  ;;  %v229_v25 = vld [vmem:[%s2550_s2 + $0x250] sm:$0xff]  ;;  %v230_v26 = vld [vmem:[%s2550_s2 + $0x258] sm:$0xff]  ;;  %v1245_v46 = vpack.c.bf16 %v630_v35, %v629_v29  ;;  %v119_v55 = vld [vmem:[%s2549_s1 + $0x2e0] sm:$0xff] }
  0x6d   :  { %v643_v17 = vadd.f32 %v515_v4, %v387_v7  ;;  %v644_v18 = vadd.f32 %v516_v9, %v388_v8  ;;  %v485_v27 = vld [vmem:[%s2551_s3 + $0x250] sm:$0xff]  ;;  %v357_v30 = vadd.f32 %v229_v25, %v101_v22  ;;  %v358_v31 = vadd.f32 %v230_v26, %v102_v23  ;;  %v486_v32 = vld [vmem:[%s2551_s3 + $0x258] sm:$0xff]  ;;  %v120_v56 = vld [vmem:[%s2549_s1 + $0x2e8] sm:$0xff] }
  0x6e   :  { %1274 = vmatprep.subr.bf16.mxu1 %v1273_v16  ;;  %v149_v33 = vld [vmem:[%s2549_s1 + $0x3d0] sm:$0xff]  ;;  %v150_v34 = vld [vmem:[%s2549_s1 + $0x3d8] sm:$0xff]  ;;  %1246 = vmatprep.subr.bf16.mxu0 %v1245_v46  ;;  %v247_v58 = vld [vmem:[%s2550_s2 + $0x2e0] sm:$0xff] }
  0x6f   :  { %v1275_v28 = vpack.c.bf16 %v644_v18, %v643_v17  ;;  %v277_v36 = vld [vmem:[%s2550_s2 + $0x3d0] sm:$0xff]  ;;  %v278_v37 = vld [vmem:[%s2550_s2 + $0x3d8] sm:$0xff]  ;;  %v613_v39 = vadd.f32 %v485_v27, %v357_v30  ;;  %v614_v40 = vadd.f32 %v486_v32, %v358_v31  ;;  %v248_v60 = vld [vmem:[%s2550_s2 + $0x2e8] sm:$0xff]  ;;  %v375_v0 = vadd.f32 %v247_v58, %v119_v55 }
  0x70   :  { %v533_v38 = vld [vmem:[%s2551_s3 + $0x3d0] sm:$0xff]  ;;  %v405_v41 = vadd.f32 %v277_v36, %v149_v33  ;;  %v406_v42 = vadd.f32 %v278_v37, %v150_v34  ;;  %v534_v43 = vld [vmem:[%s2551_s3 + $0x3d8] sm:$0xff]  ;;  %v503_v61 = vld [vmem:[%s2551_s3 + $0x2e0] sm:$0xff]  ;;  %v376_v1 = vadd.f32 %v248_v60, %v120_v56 }
  0x71   :  { %1276 = vmatpush3.bf16.msra.mxu1 %v1275_v28  ;;  %v133_v44 = vld [vmem:[%s2549_s1 + $0x350] sm:$0xff]  ;;  %v134_v45 = vld [vmem:[%s2549_s1 + $0x358] sm:$0xff]  ;;  %v1247_v50 = vpack.c.bf16 %v614_v40, %v613_v39  ;;  %v504_v2 = vld [vmem:[%s2551_s3 + $0x2e8] sm:$0xff]  ;;  %v631_v9 = vadd.f32 %v503_v61, %v375_v0 }
  0x72   :  { %v261_v47 = vld [vmem:[%s2550_s2 + $0x350] sm:$0xff]  ;;  %v262_v48 = vld [vmem:[%s2550_s2 + $0x358] sm:$0xff]  ;;  %v661_v51 = vadd.f32 %v533_v38, %v405_v41  ;;  %v662_v52 = vadd.f32 %v534_v43, %v406_v42  ;;  %v103_v3 = vld [vmem:[%s2549_s1 + $0x260] sm:$0xff]  ;;  %v632_v10 = vadd.f32 %v504_v2, %v376_v1 }
  0x73   :  { %v517_v49 = vld [vmem:[%s2551_s3 + $0x350] sm:$0xff]  ;;  %v389_v53 = vadd.f32 %v261_v47, %v133_v44  ;;  %v518_v54 = vld [vmem:[%s2551_s3 + $0x358] sm:$0xff]  ;;  %v390_v57 = vadd.f32 %v262_v48, %v134_v45  ;;  %1248 = vmatpush3.bf16.msra.mxu0 %v1247_v50  ;;  %v104_v4 = vld [vmem:[%s2549_s1 + $0x268] sm:$0xff] }
  0x74   :  { %v1277_v62 = vpack.c.bf16 %v662_v52, %v661_v51  ;;  %v231_v6 = vld [vmem:[%s2550_s2 + $0x260] sm:$0xff]  ;;  %v232_v7 = vld [vmem:[%s2550_s2 + $0x268] sm:$0xff]  ;;  %v1249_v21 = vpack.c.bf16 %v632_v10, %v631_v9  ;;  %v121_v37 = vld [vmem:[%s2549_s1 + $0x2f0] sm:$0xff] }
  0x75   :  { %v645_v63 = vadd.f32 %v517_v49, %v389_v53  ;;  %v646_v5 = vadd.f32 %v518_v54, %v390_v57  ;;  %v487_v8 = vld [vmem:[%s2551_s3 + $0x260] sm:$0xff]  ;;  %v359_v11 = vadd.f32 %v231_v6, %v103_v3  ;;  %v360_v12 = vadd.f32 %v232_v7, %v104_v4  ;;  %v488_v13 = vld [vmem:[%s2551_s3 + $0x268] sm:$0xff]  ;;  %v122_v38 = vld [vmem:[%s2549_s1 + $0x2f8] sm:$0xff] }
  0x76   :  { %1278 = vmatprep.subr.bf16.mxu1 %v1277_v62  ;;  %v151_v14 = vld [vmem:[%s2549_s1 + $0x3e0] sm:$0xff]  ;;  %v152_v15 = vld [vmem:[%s2549_s1 + $0x3e8] sm:$0xff]  ;;  %1250 = vmatprep.subr.bf16.mxu0 %v1249_v21  ;;  %v249_v40 = vld [vmem:[%s2550_s2 + $0x2f0] sm:$0xff] }
  0x77   :  { %v1279_v16 = vpack.c.bf16 %v646_v5, %v645_v63  ;;  %v279_v17 = vld [vmem:[%s2550_s2 + $0x3e0] sm:$0xff]  ;;  %v280_v18 = vld [vmem:[%s2550_s2 + $0x3e8] sm:$0xff]  ;;  %v615_v22 = vadd.f32 %v487_v8, %v359_v11  ;;  %v616_v23 = vadd.f32 %v488_v13, %v360_v12  ;;  %v250_v41 = vld [vmem:[%s2550_s2 + $0x2f8] sm:$0xff]  ;;  %v377_v45 = vadd.f32 %v249_v40, %v121_v37 }
  0x78   :  { %v535_v20 = vld [vmem:[%s2551_s3 + $0x3e0] sm:$0xff]  ;;  %v407_v24 = vadd.f32 %v279_v17, %v151_v14  ;;  %v536_v25 = vld [vmem:[%s2551_s3 + $0x3e8] sm:$0xff]  ;;  %v408_v28 = vadd.f32 %v280_v18, %v152_v15  ;;  %v505_v42 = vld [vmem:[%s2551_s3 + $0x2f0] sm:$0xff]  ;;  %v378_v46 = vadd.f32 %v250_v41, %v122_v38 }
  0x79   :  { %v135_v26 = vld [vmem:[%s2549_s1 + $0x360] sm:$0xff]  ;;  %v136_v27 = vld [vmem:[%s2549_s1 + $0x368] sm:$0xff]  ;;  %1280 = vmatpush3.bf16.msra.mxu1 %v1279_v16  ;;  %v1251_v32 = vpack.c.bf16 %v616_v23, %v615_v22  ;;  %v506_v47 = vld [vmem:[%s2551_s3 + $0x2f8] sm:$0xff]  ;;  %v633_v55 = vadd.f32 %v505_v42, %v377_v45 }
  0x7a   :  { %v263_v29 = vld [vmem:[%s2550_s2 + $0x360] sm:$0xff]  ;;  %v264_v30 = vld [vmem:[%s2550_s2 + $0x368] sm:$0xff]  ;;  %v663_v33 = vadd.f32 %v535_v20, %v407_v24  ;;  %v664_v39 = vadd.f32 %v536_v25, %v408_v28  ;;  %v105_v48 = vld [vmem:[%s2549_s1 + $0x270] sm:$0xff]  ;;  %v634_v56 = vadd.f32 %v506_v47, %v378_v46 }
  0x7b   :  { %v519_v31 = vld [vmem:[%s2551_s3 + $0x360] sm:$0xff]  ;;  %v391_v34 = vadd.f32 %v263_v29, %v135_v26  ;;  %v392_v35 = vadd.f32 %v264_v30, %v136_v27  ;;  %v520_v36 = vld [vmem:[%s2551_s3 + $0x368] sm:$0xff]  ;;  %1252 = vmatpush3.bf16.msra.mxu0 %v1251_v32  ;;  %v106_v49 = vld [vmem:[%s2549_s1 + $0x278] sm:$0xff] }
  0x7c   :  { %v1281_v50 = vpack.c.bf16 %v664_v39, %v663_v33  ;;  %v233_v51 = vld [vmem:[%s2550_s2 + $0x270] sm:$0xff]  ;;  %v234_v52 = vld [vmem:[%s2550_s2 + $0x278] sm:$0xff]  ;;  %v1253_v2 = vpack.c.bf16 %v634_v56, %v633_v55  ;;  %v673_v18 = vld [vmem:[%s2548_s0 + $0x8] sm:$0xff] }
  0x7d   :  { %v647_v43 = vadd.f32 %v519_v31, %v391_v34  ;;  %v648_v44 = vadd.f32 %v520_v36, %v392_v35  ;;  %v489_v53 = vld [vmem:[%s2551_s3 + $0x270] sm:$0xff]  ;;  %v361_v57 = vadd.f32 %v233_v51, %v105_v48  ;;  %v490_v58 = vld [vmem:[%s2551_s3 + $0x278] sm:$0xff]  ;;  %v362_v62 = vadd.f32 %v234_v52, %v106_v49 }
  0x7e   :  { %v153_v60 = vld [vmem:[%s2549_s1 + $0x3f0] sm:$0xff]  ;;  %v154_v61 = vld [vmem:[%s2549_s1 + $0x3f8] sm:$0xff]  ;;  %1282 = vmatprep.subr.bf16.mxu1 %v1281_v50  ;;  %1254 = vmatprep.subr.bf16.mxu0 %v1253_v2 }
  0x7f   :  { %v1283_v54 = vpack.c.bf16 %v648_v44, %v647_v43  ;;  %v281_v63 = vld [vmem:[%s2550_s2 + $0x3f0] sm:$0xff]  ;;  %v282_v0 = vld [vmem:[%s2550_s2 + $0x3f8] sm:$0xff]  ;;  %v617_v3 = vadd.f32 %v489_v53, %v361_v57  ;;  %v618_v9 = vadd.f32 %v490_v58, %v362_v62 }
  0x80   :  { %v537_v1 = vld [vmem:[%s2551_s3 + $0x3f0] sm:$0xff]  ;;  %v409_v4 = vadd.f32 %v281_v63, %v153_v60  ;;  %v410_v5 = vadd.f32 %v282_v0, %v154_v61  ;;  %v538_v6 = vld [vmem:[%s2551_s3 + $0x3f8] sm:$0xff] }
  0x81   :  { %1284 = vmatpush3.bf16.msra.mxu1 %v1283_v54  ;;  %v137_v7 = vld [vmem:[%s2549_s1 + $0x370] sm:$0xff]  ;;  %v138_v8 = vld [vmem:[%s2549_s1 + $0x378] sm:$0xff] }
  0x82   :  { %v265_v10 = vld [vmem:[%s2550_s2 + $0x370] sm:$0xff]  ;;  %v266_v11 = vld [vmem:[%s2550_s2 + $0x378] sm:$0xff]  ;;  %v665_v13 = vadd.f32 %v537_v1, %v409_v4  ;;  %v666_v14 = vadd.f32 %v538_v6, %v410_v5 }
  0x83   :  { %v521_v12 = vld [vmem:[%s2551_s3 + $0x370] sm:$0xff]  ;;  %v393_v15 = vadd.f32 %v265_v10, %v137_v7  ;;  %v394_v16 = vadd.f32 %v266_v11, %v138_v8  ;;  %v522_v17 = vld [vmem:[%s2551_s3 + $0x378] sm:$0xff] }
  0x84   :  { %12 = vsyncpa [#allocation3], 0  ;;  %v1255_v20 = vpack.c.bf16 %v618_v9, %v617_v3  ;;  %v706_v21 = vrot.slane %v673_v18, %v1920_v19  ;;  %v699_v22 = vcombine.high %v673_v18, %v673_v18  ;;  %v1285_v23 = vpack.c.bf16 %v666_v14, %v665_v13  ;;  %v667_v30 = vld [vmem:[%s2552_s4] sm:$0x1]  ;;  %s1318_s4 = smov [#allocation2]  }
  0x85   :  { %v649_v24 = vadd.f32 %v521_v12, %v393_v15  ;;  %v650_v25 = vadd.f32 %v522_v17, %v394_v16  ;;  %v668_v31 = vld [vmem:[%s2553_s5] sm:$0x1]  ;;  %v677_v34 = vsub.s32 0, %v1881_v59  ;;  %s1013_s5 = sshll.u32 %s1318_s4, 4  ;;  %vm1005_vm0 = vcmask 74752   ;;  %s1014_s5 = int_to_ptr.vmem [resolvable:$true] %s1013_s5 }
  0x86   :  { %1256 = vmatpush3.bf16.msra.mxu0 %v1255_v20  ;;  %v714_v26 = vcombine.high %v706_v21, %v706_v21  ;;  %v713_v27 = vrot.slane %v699_v22, %v1920_v19  ;;  %1286 = vmatprep.subr.bf16.mxu1 %v1285_v23  ;;  %v669_v32 = vadd.f32 %v668_v31, %v667_v30  ;;  %v670_v19 = vld [vmem:[%s2554_s6] sm:$0x1]  ;;  %s1293_s6 = scalar_lea.vmem %s1014_s5, 32  ;;  %p1298_p1 = scmp.lt.s32.totalorder %s1014_s5, %s1014_s5 }
  0x87   :  { %v1287_v28 = vpack.c.bf16 %v650_v25, %v649_v24  ;;  %p1294_p0 = scmp.ne.s32.totalorder %s1014_s5, %s1293_s6  ;;  %p1299_p2 = scmp.lt.s32.totalorder %s1293_s6, %s1293_s6 }
  0x88   :  { %928 = vmatprep.mubr.f32.mxu0 %v714_v26  ;;  %v715_v29 = vcombine.high %v713_v27, %v713_v27  ;;  %v671_v33 = vadd.f32 %v670_v19, %v669_v32 }
  0x89   :  { %1288 = vmatpush3.bf16.msra.mxu1 %v1287_v28  ;;  %929 = vmatmul.mubr.f32.vlgmr.msra.gmra.mrb[2].mxu0 %v706_v21  ;;  %p1300_p3 = por %p1299_p2, %p1298_p1 }
  0x8a   :  { %998 = vmatprep.mubr.f32.mxu1 %v715_v29  ;;  %v678_v36 = vrot.slane %v671_v33, %v677_v34 }
  0x8b   :  { %p1301_p4 = pnand %p1300_p3, %p1294_p0 }
  0x8c   :  { %999 = vmatmul.mubr.f32.vlgmr.msra.gmra.mrb[2].mxu1 %v713_v27 }
 0x119   :  { %v1053_v35 = vpop.f32.mrb[0].mxu0 }
 0x11a   :  { %v1054_v37 = vpop.f32.mrb[1].mxu0 }
 0x11b   :  { %v1055_v38 = vadd.f32 %v1054_v37, %v1053_v35 }
 0x11d   :  { %v791_v40 = vadd.f32 %v1055_v38, %v678_v36 }
 0x11f   :  { %v1088_v39 = vpop.f32.mrb[0].mxu1 }
 0x120   :  { %v1089_v41 = vpop.f32.mrb[1].mxu1 }
 0x121   :  { %v1090_v42 = vadd.f32 %v1089_v41, %v1088_v39 }
 0x123   :  { %v861_v43 = vadd.f32 %v1090_v42, %v791_v40 }
 0x15c   :  { %v1123_v44 = vpop.f32.mrb[2].mxu0 }
 0x15d   :  { %v1124_v45 = vpop.f32.mrb[3].mxu0 }
 0x15e   :  { %v1125_v46 = vadd.f32 %v1124_v45, %v1123_v44 }
 0x15f   :  { %v1158_v47 = vpop.f32.mrb[2].mxu1 }
 0x160   :  { %v931_v48 = vadd.f32 %v1125_v46, %v861_v43  ;;  %v1159_v49 = vpop.f32.mrb[3].mxu1 }
 0x161   :  { %v1160_v50 = vadd.f32 %v1159_v49, %v1158_v47 }
 0x163   :  { %v1001_v51 = vadd.f32 %v1160_v50, %v931_v48 }
 0x165   :  { %v1004_v59 = vmul.f32 0.33333334, %v1001_v51 }
 0x167   :  { %1006 = vst.msk [vmem:[#allocation2] sm:$0x3] %vm1005_vm0, %v1004_v59 }
 0x168   :  { %1304 = shalt.err (!%p1301_p4)
}
 0x169   :  { %s1305_s18 = scalar_lea.hbm %s2555_s7, 32 }
 0x16a   :  { %p1306_p5 = scmp.ne.s32.totalorder %s2555_s7, %s1305_s18  ;;  %p1309_p6 = scmp.lt.u32.totalorder %s1305_s18, %s2555_s7 }
 0x16c   :  { %p1311_p7 = pnand %p1309_p6, %p1306_p5 }
 0x16e   :  { %1314 = shalt.err (!%p1311_p7)
}
 0x16f   :  { %1016 = dma.vmem_to_hbm [thread:$0]  %s1014_s5, 32, %s2555_s7, [#allocation3]  }
 0x170   :  { %1315 = dma.done.wait [#allocation3], 32  }
 0x171   :  { %1316 = vsyncadd [#allocation3], 4294967264 }
 0x172   :  { %1020 = vsyncpa [#allocation3], 1 }

</bundles_post_ra>
